<compile_context>
chip_gen: v7x
topology: tpu7x:2x2x1
jax: 0.10.0
libtpu: 0.0.40
codegen_flags: <defaults>
</compile_context>

<pallas_src>
import jax
import jax.numpy as jnp
from jax.experimental import pallas as pl
from jax.experimental.pallas import tpu as pltpu


def _identity_dma_kernel(x_hbm_ref, o_hbm_ref, sem):
    # Whole-array HBM -> HBM copy driven by the DMA engine; no VMEM staging.
    copy = pltpu.make_async_copy(x_hbm_ref, o_hbm_ref, sem)
    copy.start()
    copy.wait()


def _materialized_identity(x: jax.Array) -> jax.Array:
    return pl.pallas_call(
        _identity_dma_kernel,
        out_shape=jax.ShapeDtypeStruct(x.shape, x.dtype),
        in_specs=[pl.BlockSpec(memory_space=pl.ANY)],   # raw HBM ref, no auto-DMA
        out_specs=pl.BlockSpec(memory_space=pl.ANY),    # raw HBM ref, no auto-DMA
        scratch_shapes=[pltpu.SemaphoreType.DMA],
    )(x)


def identity(x: jax.Array, *, materialize: bool = False) -> jax.Array:
    """Identity.forward(x) -> x.

    Default is the zero-cost pass-through (exactly nn.Identity semantics).
    Set materialize=True to force a fresh output buffer, produced by a direct
    HBM->HBM DMA inside a Pallas kernel (no VMEM staging, no tiling grid).
    """
    if not materialize:
        # Zero required bytes / FLOPs: the fastest identity is no kernel at all.
        return x
    if x.ndim == 0 or x.size == 0:
        # Nothing to DMA; pass-through is exact.
        return x
    return _materialized_identity(x)


if __name__ == "__main__":
    key = jax.random.PRNGKey(0)
    k1, k2, k3 = jax.random.split(key, 3)

    # ResNet-style NCHW activation: exercise the materialized HBM->HBM DMA path.
    x1 = jax.random.normal(k1, (2, 4, 16, 16), dtype=jnp.float32)
    y1 = identity(x1, materialize=True)

    # Larger activation, also through the DMA kernel.
    x2 = jax.random.normal(k2, (8, 8, 32, 32), dtype=jnp.float32)
    y2 = identity(x2, materialize=True)

    # Awkward (non-128-multiple) shape: DMA handles it directly — no lane-dense
    # reshape needed — plus the default zero-copy pass-through path.
    x3 = jax.random.normal(k3, (2, 3, 5, 7), dtype=jnp.float32)
    y3 = identity(x3, materialize=True)
    y3_passthrough = identity(x3)

    jax.block_until_ready((y1, y2, y3, y3_passthrough))

    for xi, yi in ((x1, y1), (x2, y2), (x3, y3), (x3, y3_passthrough)):
        assert yi.shape == xi.shape and yi.dtype == xi.dtype
        assert bool(jnp.all(yi == xi))
    print("KERNEL_OK")
</pallas_src>

<mosaic_0001>
module attributes {stable_mosaic.version = 11 : i64} {
  func.func @_identity_dma_kernel(%arg0: memref<2x4x16x16xf32, #tpu.memory_space<any>>, %arg1: memref<2x4x16x16xf32, #tpu.memory_space<any>>, %arg2: memref<!tpu.dma_semaphore, #tpu.memory_space<semaphore_mem>>) attributes {dimension_semantics = [], scalar_prefetch = 0 : i64, scratch_operands = 1 : i64, tpu.core_type = #tpu.core_type<tc>} {
    tpu.enqueue_dma source(%arg0 : memref<2x4x16x16xf32, #tpu.memory_space<any>>) target(%arg1 : memref<2x4x16x16xf32, #tpu.memory_space<any>>) target_semaphore(%arg2 : memref<!tpu.dma_semaphore, #tpu.memory_space<semaphore_mem>>)
    tpu.wait_dma2 semaphore(%arg2 : memref<!tpu.dma_semaphore, #tpu.memory_space<semaphore_mem>>) src(%arg0 : memref<2x4x16x16xf32, #tpu.memory_space<any>>) dst(%arg1 : memref<2x4x16x16xf32, #tpu.memory_space<any>>)
    return
  }
}

</mosaic_0001>

<bundles_post_ra>
// kernel: tpu_custom_call.1
= control target key start
LH: loop header
LB: loop body
LE: loop exit
PB: predicated region body
PF: predicated region fallthrough
CT: control target
= control target key end

     0   :  { %s36_s6 = smov [#allocation2]   ;;  %s37_s7 = smov [#allocation3]   ;;  %s55_s0 = inlined_call_operand.hbm [shape: f32[2,4,16,16], index: 0, kind: input, shape index: {}]   ;;  %s56_s1 = inlined_call_operand.hbm [shape: f32[2,4,16,16], index: 1, kind: output, shape index: {}]  }
   0x1   :  { %s38_s8 = smov 0  }
   0x2   :  { %18 = dma.general %s55_s0, 2048, %s56_s1, %s36_s6, %s37_s7, [#allocation4], %s38_s8, 0  }
   0x3   :  { %34 = dma.done.wait [#allocation2], 2048 }
   0x4   :  { %35 = vsyncadd [#allocation2], 4294965248 }
   0x5   :  { %24 = vsyncmov [#allocation2] }
   0x8   :  { %s25_s13 = vpop.sfrf %24 }
   0x9   :  { %p30_p0 = scmp.ne.s32.totalorder %s25_s13, 0 }
   0xb   :  { %29 = shalt.err (%p30_p0)  }

</bundles_post_ra>
